<compile_context>
chip_gen: v6e
topology: v6e:2x2x1
jax: 0.10.0
libtpu: 0.0.40
codegen_flags: <defaults>
</compile_context>

<pallas_src>
import functools

import jax
import jax.numpy as jnp
from jax.experimental import pallas as pl
from jax.experimental.pallas import tpu as pltpu


_MAX_BN = 32          # samples per block (the per-sample gate loop is unrolled)


def _round_up(v, m):
    return -(-v // m) * m


def _tpu_budgets():
    """Per-generation (vmem_limit_bytes, target_block_bytes, two_tensorcores)."""
    try:
        info = pltpu.get_tpu_info()
        vmem_phys = int(getattr(info, "vmem_capacity_bytes", 0)) or (64 << 20)
    except Exception:              # query failed -> conservative v7x-class setup
        vmem_phys = 64 << 20
    if vmem_phys <= (96 << 20):
        # v7x-class: 64 MiB VMEM per TensorCore, 2 TCs per chip, 3.2 TB/s HBM.
        return 44 << 20, 6 << 20, True
    # v5e / v6e-class: 128 MiB physical VMEM, single TensorCore.
    return 96 << 20, 8 << 20, False


def _vmem_sample_bytes(c, hw, itemsize):
    """VMEM bytes of one (C, HW) sample after (sublane, lane) tile padding."""
    packing = max(1, 4 // itemsize)                    # 1 f32, 2 bf16, 4 int8
    return _round_up(c, 8 * packing) * _round_up(hw, 128) * itemsize


def _pick_block_n(n, per_sample_bytes, target_block_bytes, two_tc):
    bn = max(1, target_block_bytes // max(1, per_sample_bytes))
    bn = min(bn, n, _MAX_BN)
    if two_tc and n > 1:
        bn = min(bn, -(-n // 2))       # keep >=2 grid steps for the 2 v7x TCs
    return int(bn)


def _pick_thw(c_pad, hw, itemsize, target_block_bytes):
    """Spatial tile (multiple of 128 lanes) for the two-phase fallback."""
    thw = (target_block_bytes // max(1, c_pad * itemsize)) // 128 * 128
    return min(hw, max(128, thw))


# --------------------------------------------------------------------------- #
# Main path: whole samples resident per grid step.
# --------------------------------------------------------------------------- #
def _se_kernel(x_ref, w1_ref, b1_ref, w2_ref, b2_ref, o_ref):
    """SE on a (BN, C, HW) block: channels on sublanes, spatial on lanes."""
    bn, c, hw = x_ref.shape

    # ---- Squeeze: spatial mean, f32 accumulation, chunked over HW so the f32
    # upcast temporary stays ~<=2 MiB and no block-sized value lives across the
    # matmul section (x is simply re-read from VMEM for the excite below).
    chunk = max(128, ((2 << 20) // max(1, bn * c * 4)) // 128 * 128)
    chunk = min(hw, chunk)
    pooled = jnp.zeros((bn, c, 1), jnp.float32)
    start = 0
    while start < hw:                                  # static Python loop
        size = min(chunk, hw - start)
        xs = x_ref[:, :, start:start + size].astype(jnp.float32)
        pooled = pooled + jnp.sum(xs, axis=2, keepdims=True)
        start += size
    pooled = pooled * (1.0 / hw)                       # (BN, C, 1)

    w1 = w1_ref[...].astype(jnp.float32)               # (C_mid, C)
    w2 = w2_ref[...].astype(jnp.float32)               # (C, C_mid)
    b1 = b1_ref[...]                                   # (C_mid, 1) f32
    b2 = b2_ref[...]                                   # (C, 1)     f32

    # ---- Excitation + scale, one sample at a time (BN small, static unroll).
    # (C, 1) column vectors keep channels on the sublane axis end-to-end, so the
    # final multiply is a plain lane-broadcast with no relayouts.
    for i in range(bn):
        p = pooled[i]                                                  # (C, 1)
        h = jnp.dot(w1, p, preferred_element_type=jnp.float32) + b1    # (C_mid, 1)
        h = h * jax.nn.sigmoid(h)                                      # SiLU
        s = jnp.dot(w2, h, preferred_element_type=jnp.float32) + b2    # (C, 1)
        gate = jax.nn.sigmoid(s).astype(x_ref.dtype)
        o_ref[i] = x_ref[i] * gate                     # broadcast over HW lanes


def _se_whole_sample(x3, w1, b1c, w2, b2c, bn, vmem_limit, donate_x):
    n, c, hw = x3.shape
    c_mid = w1.shape[0]
    itemsize = jnp.dtype(x3.dtype).itemsize
    cost = pl.CostEstimate(
        flops=n * (2 * c * hw + 4 * c * c_mid),
        transcendentals=n * (c + c_mid),
        bytes_accessed=2 * n * c * hw * itemsize + 2 * c * c_mid * w1.dtype.itemsize,
    )
    alias = {"input_output_aliases": {0: 0}} if donate_x else {}
    return pl.pallas_call(
        _se_kernel,
        out_shape=jax.ShapeDtypeStruct((n, c, hw), x3.dtype),
        grid_spec=pltpu.PrefetchScalarGridSpec(
            num_scalar_prefetch=0,
            grid=(pl.cdiv(n, bn),),
            in_specs=[
                pl.BlockSpec((bn, c, hw), lambda i: (i, 0, 0)),
                pl.BlockSpec((c_mid, c), lambda i: (0, 0)),
                pl.BlockSpec((c_mid, 1), lambda i: (0, 0)),
                pl.BlockSpec((c, c_mid), lambda i: (0, 0)),
                pl.BlockSpec((c, 1), lambda i: (0, 0)),
            ],
            out_specs=pl.BlockSpec((bn, c, hw), lambda i: (i, 0, 0)),
        ),
        compiler_params=pltpu.CompilerParams(
            dimension_semantics=("parallel",),
            vmem_limit_bytes=vmem_limit,
        ),
        cost_estimate=cost,
        **alias,
    )(x3, w1, b1c, w2, b2c)


# --------------------------------------------------------------------------- #
# Fallback path: HW-tiled two-phase (pool -> tiny JAX gate -> scale).
# --------------------------------------------------------------------------- #
def _se_pool_kernel(x_ref, sum_ref, *, hw_total):
    """Phase 1: accumulate the spatial sum of one sample over HW tiles."""
    j = pl.program_id(1)

    @pl.when(j == 0)
    def _init():
        sum_ref[...] = jnp.zeros_like(sum_ref)

    bn, c, thw = x_ref.shape
    xs = x_ref[...].astype(jnp.float32)
    if hw_total % thw != 0:                            # mask the ragged last tile
        lane = jax.lax.broadcasted_iota(jnp.int32, (bn, c, thw), 2)
        xs = jnp.where(j * thw + lane < hw_total, xs, 0.0)
    sum_ref[...] += jnp.sum(xs, axis=2, keepdims=True)


def _se_scale_kernel(x_ref, g_ref, o_ref):
    """Phase 2: y = x * gate, gate broadcast over the spatial (lane) axis."""
    o_ref[...] = x_ref[...] * g_ref[...]


def _se_two_phase(x3, w1, b1, w2, b2, thw, vmem_limit, donate_x):
    n, c, hw = x3.shape
    dtype = x3.dtype
    itemsize = jnp.dtype(dtype).itemsize
    hw_steps = pl.cdiv(hw, thw)

    # Phase 1: per-sample spatial sums, accumulated across the HW grid axis.
    pooled_sum = pl.pallas_call(
        functools.partial(_se_pool_kernel, hw_total=hw),
        out_shape=jax.ShapeDtypeStruct((n, c, 1), jnp.float32),
        grid_spec=pltpu.PrefetchScalarGridSpec(
            num_scalar_prefetch=0,
            grid=(n, hw_steps),
            in_specs=[pl.BlockSpec((1, c, thw), lambda i, j: (i, 0, j))],
            out_specs=pl.BlockSpec((1, c, 1), lambda i, j: (i, 0, 0)),
        ),
        compiler_params=pltpu.CompilerParams(
            dimension_semantics=("parallel", "arbitrary"),
            vmem_limit_bytes=vmem_limit,
        ),
        cost_estimate=pl.CostEstimate(
            flops=n * c * hw, transcendentals=0,
            bytes_accessed=n * c * hw * itemsize + n * c * 4),
    )(x3)

    # Tiny excitation MLP in plain JAX (N x C work: negligible), f32 math.
    pooled = pooled_sum[:, :, 0] * (1.0 / hw)                          # (N, C)
    h = pooled @ w1.astype(jnp.float32).T + b1.astype(jnp.float32)[None, :]
    h = h * jax.nn.sigmoid(h)                                          # SiLU
    s = jax.nn.sigmoid(h @ w2.astype(jnp.float32).T + b2.astype(jnp.float32)[None, :])
    gate = s.astype(dtype).reshape(n, c, 1)

    # Phase 2: y = x * gate over HW tiles (both grid axes parallel).
    alias = {"input_output_aliases": {0: 0}} if donate_x else {}
    return pl.pallas_call(
        _se_scale_kernel,
        out_shape=jax.ShapeDtypeStruct((n, c, hw), dtype),
        grid_spec=pltpu.PrefetchScalarGridSpec(
            num_scalar_prefetch=0,
            grid=(n, hw_steps),
            in_specs=[pl.BlockSpec((1, c, thw), lambda i, j: (i, 0, j)),
                      pl.BlockSpec((1, c, 1), lambda i, j: (i, 0, 0))],
            out_specs=pl.BlockSpec((1, c, thw), lambda i, j: (i, 0, j)),
        ),
        compiler_params=pltpu.CompilerParams(
            dimension_semantics=("parallel", "parallel"),
            vmem_limit_bytes=vmem_limit,
        ),
        cost_estimate=pl.CostEstimate(
            flops=n * c * hw, transcendentals=0,
            bytes_accessed=2 * n * c * hw * itemsize),
        **alias,
    )(x3, gate)


# --------------------------------------------------------------------------- #
# Public wrapper.
# --------------------------------------------------------------------------- #
def se_block(x_nchw, w1, b1, w2, b2, *, max_block_bytes=None, donate_x=False):
    """y = x * sigmoid(W2 @ silu(W1 @ mean_{H,W}(x) + b1) + b2), NCHW in/out.

    w1: (C_mid, C), b1: (C_mid,), w2: (C, C_mid), b2: (C,). Weights are used in
    their own dtype (gate math accumulates in f32 either way). donate_x=True
    adds input_output_aliases={x: out}; only useful if the caller donates x.
    """
    n, c, h, w = x_nchw.shape
    c_mid = w1.shape[0]
    hw = h * w
    dtype = x_nchw.dtype
    itemsize = jnp.dtype(dtype).itemsize

    # NCHW -> (N, C, HW) is a contiguous merge of H and W: no HBM copy (unlike
    # the previous (N, HW, C) layout which cost two full transpose passes).
    x3 = x_nchw.reshape(n, c, hw)

    vmem_limit, target_block, two_tc = _tpu_budgets()
    if max_block_bytes is not None:
        target_block = min(target_block, int(max_block_bytes))

    per_sample = _vmem_sample_bytes(c, hw, itemsize)
    # Largest whole-sample block the double-buffered pipeline tolerates:
    # 2 input + 2 output buffers + ~1 block of transient/weight headroom.
    max_fit = max(target_block, (vmem_limit - (4 << 20)) // 5)
    if max_block_bytes is not None:
        max_fit = min(max_fit, int(max_block_bytes))

    packing = max(1, 4 // itemsize)
    c_pad = _round_up(c, 8 * packing)
    thw = _pick_thw(c_pad, hw, itemsize, target_block)

    # Spatial split when a whole sample does not fit the block budget, or to put
    # both v7x TensorCores to work when there is only a single (large) sample.
    split = per_sample > max_fit or (
        two_tc and n == 1 and per_sample >= (4 << 20) and pl.cdiv(hw, thw) >= 2)

    if split:
        # TODO(synk): a single-pass variant (whole sample resident in VMEM with
        # an inner HW-tiled DMA pipeline) would keep HBM traffic at the 2-pass
        # floor; this two-phase scheme costs ~1.5x traffic but handles any size.
        out3 = _se_two_phase(x3, w1, b1, w2, b2, thw, vmem_limit, donate_x)
    else:
        bn = _pick_block_n(n, per_sample, target_block, two_tc)
        b1c = b1.astype(jnp.float32).reshape(c_mid, 1)
        b2c = b2.astype(jnp.float32).reshape(c, 1)
        out3 = _se_whole_sample(x3, w1, b1c, w2, b2c, bn, vmem_limit, donate_x)

    return out3.reshape(n, c, h, w)


def se_block_ref(x, w1, b1, w2, b2):
    """Pure-JAX reference (matches PyTorch SEBlock.forward), f32 math."""
    xf = x.astype(jnp.float32)
    pooled = jnp.mean(xf, axis=(2, 3))                         # (N, C)
    h = pooled @ w1.astype(jnp.float32).T + b1                 # (N, C_mid)
    h = h * jax.nn.sigmoid(h)                                  # SiLU
    s = jax.nn.sigmoid(h @ w2.astype(jnp.float32).T + b2)      # (N, C)
    return xf * s[:, :, None, None]


if __name__ == "__main__":
    key = jax.random.PRNGKey(0)
    k_x, k_w1, k_b1, k_w2, k_b2 = jax.random.split(key, 5)

    N, C, H, W = 2, 4, 16, 16      # in_channels = 4
    C_mid = 8                      # out_channels of the first 1x1 conv

    x = jax.random.normal(k_x, (N, C, H, W), dtype=jnp.float32)
    w1 = jax.random.normal(k_w1, (C_mid, C), dtype=jnp.float32) * 0.2
    b1 = jax.random.normal(k_b1, (C_mid,), dtype=jnp.float32) * 0.1
    w2 = jax.random.normal(k_w2, (C, C_mid), dtype=jnp.float32) * 0.2
    b2 = jax.random.normal(k_b2, (C,), dtype=jnp.float32) * 0.1

    y_ref = se_block_ref(x, w1, b1, w2, b2)

    # Main (whole-sample-block) path, f32.
    y = jax.block_until_ready(se_block(x, w1, b1, w2, b2))
    assert y.dtype == x.dtype, "output dtype must match input dtype"
    assert jnp.allclose(y, y_ref, atol=1e-5, rtol=1e-5), "f32 mismatch vs reference"

    # Two-phase (HW-tiled pool + scale) fallback, forced via a tiny block budget
    # so it is exercised at these small shapes (HW=256 -> 2 spatial tiles).
    y2 = jax.block_until_ready(se_block(x, w1, b1, w2, b2, max_block_bytes=2048))
    assert jnp.allclose(y2, y_ref, atol=1e-5, rtol=1e-5), "two-phase mismatch"

    # Native bf16 activations (weights stay f32; no silent weight downcast).
    xb = x.astype(jnp.bfloat16)
    yb = jax.block_until_ready(se_block(xb, w1, b1, w2, b2))
    assert yb.dtype == jnp.bfloat16, "bf16 input must give bf16 output"
    yb_ref = se_block_ref(xb, w1, b1, w2, b2)
    assert jnp.allclose(yb.astype(jnp.float32), yb_ref, atol=5e-2, rtol=5e-2), \
        "bf16 mismatch vs reference"

    print("KERNEL_OK")
</pallas_src>

<mosaic_0001>
module attributes {stable_mosaic.version = 11 : i64} {
  func.func @_se_kernel(%arg0: i32, %arg1: memref<1x4x256xf32, #tpu.memory_space<vmem>>, %arg2: memref<8x4xf32, #tpu.memory_space<vmem>>, %arg3: memref<8x1xf32, #tpu.memory_space<vmem>>, %arg4: memref<4x8xf32, #tpu.memory_space<vmem>>, %arg5: memref<4x1xf32, #tpu.memory_space<vmem>>, %arg6: memref<1x4x256xf32, #tpu.memory_space<vmem>>) attributes {dimension_semantics = [#tpu.dimension_semantics<parallel>], iteration_bounds = array<i64: 2>, scalar_prefetch = 0 : i64, scratch_operands = 0 : i64, tpu.core_type = #tpu.core_type<tc>, window_params = [{transform_indices = @transform_0, window_bounds = array<i64: 1, 4, 256>}, {pipeline_mode = #tpu.pipeline_mode<synchronous>, transform_indices = @transform_1, window_bounds = array<i64: 8, 4>}, {pipeline_mode = #tpu.pipeline_mode<synchronous>, transform_indices = @transform_2, window_bounds = array<i64: 8, 1>}, {pipeline_mode = #tpu.pipeline_mode<synchronous>, transform_indices = @transform_3, window_bounds = array<i64: 4, 8>}, {pipeline_mode = #tpu.pipeline_mode<synchronous>, transform_indices = @transform_4, window_bounds = array<i64: 4, 1>}, {transform_indices = @transform_5, window_bounds = array<i64: 1, 4, 256>}]} {
    %cst = arith.constant 0.000000e+00 : f32
    %0 = vector.broadcast %cst : f32 to vector<1x4x1xf32>
    %c0 = arith.constant 0 : index
    %c0_0 = arith.constant 0 : index
    %c0_1 = arith.constant 0 : index
    %1 = vector.load %arg1[%c0, %c0_0, %c0_1] : memref<1x4x256xf32, #tpu.memory_space<vmem>>, vector<1x4x256xf32>
    %cst_2 = arith.constant dense<0.000000e+00> : vector<1x4xf32>
    %2 = vector.multi_reduction <add>, %1, %cst_2 [2] : vector<1x4x256xf32> to vector<1x4xf32>
    %3 = vector.shape_cast %2 : vector<1x4xf32> to vector<1x4x1xf32>
    %4 = arith.addf %0, %3 : vector<1x4x1xf32>
    %cst_3 = arith.constant 3.906250e-03 : f32
    %5 = vector.broadcast %cst_3 : f32 to vector<1x4x1xf32>
    %6 = arith.mulf %4, %5 : vector<1x4x1xf32>
    %c0_4 = arith.constant 0 : index
    %c0_5 = arith.constant 0 : index
    %7 = vector.load %arg2[%c0_4, %c0_5] : memref<8x4xf32, #tpu.memory_space<vmem>>, vector<8x4xf32>
    %c0_6 = arith.constant 0 : index
    %c0_7 = arith.constant 0 : index
    %8 = vector.load %arg4[%c0_6, %c0_7] : memref<4x8xf32, #tpu.memory_space<vmem>>, vector<4x8xf32>
    %c0_8 = arith.constant 0 : index
    %c0_9 = arith.constant 0 : index
    %9 = vector.load %arg3[%c0_8, %c0_9] : memref<8x1xf32, #tpu.memory_space<vmem>>, vector<8x1xf32>
    %c0_10 = arith.constant 0 : index
    %c0_11 = arith.constant 0 : index
    %10 = vector.load %arg5[%c0_10, %c0_11] : memref<4x1xf32, #tpu.memory_space<vmem>>, vector<4x1xf32>
    %11 = vector.shape_cast %6 : vector<1x4x1xf32> to vector<4x1xf32>
    %cst_12 = arith.constant dense<0.000000e+00> : vector<8x1xf32>
    %12 = tpu.matmul %7, %11, %cst_12 {dimension_numbers = #tpu.dot_dimension_numbers<[1], [0], [0], [1], [0, 0, 1, 1], [], []>} : vector<8x4xf32>, vector<4x1xf32>, vector<8x1xf32> -> vector<8x1xf32>
    %13 = arith.addf %12, %9 : vector<8x1xf32>
    %14 = arith.negf %13 : vector<8x1xf32>
    %15 = math.exp %14 : vector<8x1xf32>
    %cst_13 = arith.constant 1.000000e+00 : f32
    %16 = vector.broadcast %cst_13 : f32 to vector<8x1xf32>
    %17 = arith.addf %16, %15 : vector<8x1xf32>
    %18 = arith.divf %16, %17 : vector<8x1xf32>
    %19 = arith.mulf %13, %18 : vector<8x1xf32>
    %cst_14 = arith.constant dense<0.000000e+00> : vector<4x1xf32>
    %20 = tpu.matmul %8, %19, %cst_14 {dimension_numbers = #tpu.dot_dimension_numbers<[1], [0], [0], [1], [0, 0, 1, 1], [], []>} : vector<4x8xf32>, vector<8x1xf32>, vector<4x1xf32> -> vector<4x1xf32>
    %21 = arith.addf %20, %10 : vector<4x1xf32>
    %22 = arith.negf %21 : vector<4x1xf32>
    %23 = math.exp %22 : vector<4x1xf32>
    %cst_15 = arith.constant 1.000000e+00 : f32
    %24 = vector.broadcast %cst_15 : f32 to vector<4x1xf32>
    %25 = arith.addf %24, %23 : vector<4x1xf32>
    %26 = arith.divf %24, %25 : vector<4x1xf32>
    %c0_16 = arith.constant 0 : index
    %c0_17 = arith.constant 0 : index
    %c0_18 = arith.constant 0 : index
    %27 = vector.load %arg1[%c0_16, %c0_17, %c0_18] : memref<1x4x256xf32, #tpu.memory_space<vmem>>, vector<1x4x256xf32>
    %28 = vector.shape_cast %27 : vector<1x4x256xf32> to vector<4x256xf32>
    %29 = vector.broadcast %26 : vector<4x1xf32> to vector<4x256xf32>
    %30 = arith.mulf %28, %29 : vector<4x256xf32>
    %c0_19 = arith.constant 0 : index
    %c0_20 = arith.constant 0 : index
    %c0_21 = arith.constant 0 : index
    %31 = vector.load %arg6[%c0_19, %c0_20, %c0_21] : memref<1x4x256xf32, #tpu.memory_space<vmem>>, vector<1x4x256xf32>
    %32 = vector.shape_cast %31 : vector<1x4x256xf32> to vector<4x256xf32>
    %33 = vector.shape_cast %30 : vector<4x256xf32> to vector<1x4x256xf32>
    tpu.vector_store %arg6[%c0_19, %c0_20, %c0_21], %33 {strides = array<i32>} : memref<1x4x256xf32, #tpu.memory_space<vmem>>, vector<1x4x256xf32>,
    return
  }
  func.func @transform_0(%arg0: i32) -> (i32, i32, i32) {
    %c0_i32 = arith.constant 0 : i32
    %c0_i32_0 = arith.constant 0 : i32
    %c0_i32_1 = arith.constant 0 : i32
    return %arg0, %c0_i32, %c0_i32_0 : i32, i32, i32
  }
  func.func @transform_1(%arg0: i32) -> (i32, i32) {
    %c0_i32 = arith.constant 0 : i32
    %c0_i32_0 = arith.constant 0 : i32
    %c0_i32_1 = arith.constant 0 : i32
    return %c0_i32, %c0_i32_0 : i32, i32
  }
  func.func @transform_2(%arg0: i32) -> (i32, i32) {
    %c0_i32 = arith.constant 0 : i32
    %c0_i32_0 = arith.constant 0 : i32
    %c0_i32_1 = arith.constant 0 : i32
    return %c0_i32, %c0_i32_0 : i32, i32
  }
  func.func @transform_3(%arg0: i32) -> (i32, i32) {
    %c0_i32 = arith.constant 0 : i32
    %c0_i32_0 = arith.constant 0 : i32
    %c0_i32_1 = arith.constant 0 : i32
    return %c0_i32, %c0_i32_0 : i32, i32
  }
  func.func @transform_4(%arg0: i32) -> (i32, i32) {
    %c0_i32 = arith.constant 0 : i32
    %c0_i32_0 = arith.constant 0 : i32
    %c0_i32_1 = arith.constant 0 : i32
    return %c0_i32, %c0_i32_0 : i32, i32
  }
  func.func @transform_5(%arg0: i32) -> (i32, i32, i32) {
    %c0_i32 = arith.constant 0 : i32
    %c0_i32_0 = arith.constant 0 : i32
    %c0_i32_1 = arith.constant 0 : i32
    return %arg0, %c0_i32, %c0_i32_0 : i32, i32, i32
  }
}

</mosaic_0001>

<bundles_post_ra>
// kernel: tpu_custom_call.1
= control target key start
LH: loop header
LB: loop body
LE: loop exit
PB: predicated region body
PF: predicated region fallthrough
CT: control target
= control target key end

     0   :  { %10 = vsyncpa [#allocation3], 0  ;;  %s776_s0 = inlined_call_operand.vmem [shape: f32[2,4,256], index: 0, kind: input, shape index: {}]   ;;  %s777_s1 = inlined_call_operand.vmem [shape: f32[8,4], index: 1, kind: input, shape index: {}]   ;;  %s778_s2 = inlined_call_operand.vmem [shape: f32[8,1], index: 2, kind: input, shape index: {}]   ;;  %s779_s3 = inlined_call_operand.vmem [shape: f32[4,8], index: 3, kind: input, shape index: {}]   ;;  %s780_s4 = inlined_call_operand.vmem [shape: f32[4,1], index: 4, kind: input, shape index: {}]   ;;  %s781_s5 = inlined_call_operand.hbm [shape: f32[2,4,256], index: 5, kind: output, shape index: {}]  }
   0x1   :  { %12 = vsyncpa [#allocation3 + $0x1], 0  ;;  %s674_s18 = smov 0   ;;  %s676_s19 = smov 0  }
   0x2   :  { %s678_s20 = smov 0   ;;  %s680_s21 = smov 0  }
   0x3 LB: > { %s695_s22 = sadd.s32 4294967295, %s637_s21   ;;  %s491_s23 = sadd.s32 4294967294, %s637_s21   ;;  %s637_s21 = sphi %s680_s21, %s787_s21   ;;  %s633_s20 = sphi %s678_s20, %s786_s20   ;;  %s629_s19 = sphi %s676_s19, %s785_s19   ;;  %s625_s18 = sphi %s674_s18, %s784_s18  }
   0x4   : > { %s699_s24 = sadd.s32 1, %s637_s21   ;;  %s135_s25 = sadd.s32 1, %s633_s20 }
   0x5   : > { %s132_s26 = ssub.s32 %s637_s21, %s699_s24  ;;  %p145_p0 = scmp.ne.s32.totalorder %s633_s20, %s629_s19 }
   0x6   : > { %p133_p1 = scmp.eq.s32.totalorder %s132_s26, 0  ;;  %p146_p2 = scmp.eq.s32.totalorder %s695_s22, 1 }
   0x7   : > { %p151_p3 = scmp.ne.s32.totalorder %s629_s19, %s625_s18  ;;  %p152_p4 = scmp.eq.s32.totalorder %s491_s23, 1 }
   0x8   : > { %s710_s27 = scalar_select %p133_p1, %s633_s20, %s135_s25  }
   0x9   : > { %p712_p5 = por %p146_p2, %p145_p0  ;;  %p716_p6 = por %p152_p4, %p151_p3 }
   0xa   : > { %p494_p7 = scmp.ge.s32.totalorder %s637_s21, 1  ;;  %p190_p8 = scmp.lt.s32.totalorder %s637_s21, 3 }
   0xc   : > { %p191_p9 = pnand %p494_p7, %p190_p8 }
   0xd   : > { %p218_p10 = scmp.lt.s32.totalorder (!%p191_p9), %s695_s22, 1  ;;  %s215_s23 = sand.u32 (!%p191_p9), 1, %s629_s19  }
   0xe   : > { %194 = sbr.rel (%p191_p9) target bundleno = 768 (0x300), region = 40  ;;  %s495_s25 = sshll.u32 (!%p191_p9), %s215_s23, 3 }
   0xf   : > { %s509_s26 = sshll.u32 (!%p191_p9), %s695_s22, 7  ;;  %s418_s10 = scalar_lea.sflag (!%p191_p9), [#allocation3], %s215_s23 }
  0x10   : > { %s643_s12 = smov (!%p191_p9), [#allocation2]  }
  0x11   : > { %s581_s13 = sshll.u32 (!%p191_p9), %s643_s12, 4  ;;  %s582_s13 = int_to_ptr.vmem [resolvable:$false] %s581_s13 }
  0x13   : > { %s219_s30 = scalar_select %p218_p10, %s695_s22, 1  ;;  %vm227_vm0 = vcmask 1043456   ;;  %v639_v5 = vmov 0.0   ;;  %vm640_vm1 = vmmov 0   ;;  %v235_v8 = vld [vmem:[%s777_s1] sm:$0xff]  ;;  %vm239_vm2 = vcmask 31744  }
  0x14   : > { %514 = vmatprep.subr.mxu0 %v639_v5  ;;  %519 = vmatprep.subr.mxu1 %v639_v5  ;;  %v237_v9 = vld [vmem:[%s778_s2] sm:$0xff]  ;;  %vm323_vm3 = vcmask 64512   ;;  %v641_v19 = vmov 0   ;;  %v642_v28 = vmov 839922192   ;;  %v410_v30 = vlaneseq  ;;  %s583_s22 = scalar_lea.vmem %s582_s13, 256 }
  0x15   : > { %s508_s6 = sshll.u32 %s219_s30, 3  ;;  %516 = vmatprep.mubr.msk.f32.mxu0 %vm640_vm1, %v639_v5  ;;  %521 = vmatprep.mubr.msk.f32.mxu1 %vm640_vm1, %v639_v5  ;;  %v236_v18 = vld [vmem:[%s779_s3] sm:$0xf]  ;;  %v408_v29 = vunpack.c.l.s4 %v642_v28  ;;  %s217_s30 = scalar_lea.vmem [#allocation2], %s495_s25 }
  0x16   : > { %s222_s9 = scalar_lea.vmem %s776_s0, %s508_s6  ;;  %567 = vset.pattern.permute.xlu0 %v641_v19  ;;  %v238_v20 = vld [vmem:[%s780_s4] sm:$0xf]  ;;  %v411_v32 = vshrl.u32 %v410_v30, 7  ;;  %s432_s6 = sshll.u32 %s217_s30, 4  ;;  %s433_s6 = int_to_ptr.vmem [resolvable:$true] %s432_s6 }
  0x17   : > { %v223_v0 = vld [vmem:[%s222_s9] sm:$0xff]  ;;  %v409_v31 = vunpack.c.0.s8 %v408_v29  ;;  %s430_s9 = scalar_lea.hbm %s781_s5, %s509_s26  ;;  %s577_s11 = scalar_lea.vmem %s433_s6, 128 }
  0x18   : > { %v225_v1 = vcombine.high %v223_v0, %v223_v0  ;;  %v228_v2 = vsel %vm227_vm0, %v223_v0, 0.0  ;;  %p578_p11 = scmp.ne.s32.totalorder %s433_s6, %s577_s11  ;;  %p584_p0 = scmp.lt.s32.totalorder %s433_s6, %s582_s13 }
  0x19   : > { %v412_v33 = vsub.s32 %v409_v31, %v411_v32  ;;  %p585_p1 = scmp.lt.s32.totalorder %s583_s22, %s577_s11 }
  0x1a   : > { %v229_v3 = vsel %vm227_vm0, %v225_v1, 0.0  ;;  %p579_p12 = pnand %p578_p11, %p712_p5 }
  0x1b   : > { %v230_v4 = vadd.f32 %v229_v3, %v228_v2  ;;  %p586_p2 = por %p585_p1, %p584_p0 }
  0x1c   : > { %p580_p13 = pneg %p579_p12 }
  0x1d   : > { %231 = vadd.xlane.f32.xlu0 %v230_v4 }
  0x1e   : > { %p587_p3 = pnand %p586_p2, %p580_p13 }
  0xa6   : > { %v232_v6 = vpop.xlane.xlu0 %231 }
  0xa7   : > { %v234_v7 = vmul.f32 0.00390625, %v232_v6 }
  0xa9   : > { %515 = vmatpush3.msk.msra.mxu0 %vm227_vm0, %v234_v7 }
  0xaa   : > { %517 = vmatmul.mubr.msk.f32.vlgmr.msra.gmra.mxu0 %vm239_vm2, %v235_v8 }
 0x16a   : > { %v312_v10 = vpop.f32.mrf.mxu0 }
 0x16b   : > { %v313_v11 = vadd.f32 %v312_v10, %v237_v9 }
 0x16c   : > { %v518_v12 = vpop.f32.mrf.mxu0 }
 0x16d   : > { %v500_v13 = vmul.f32 -1.442695, %v313_v11 }
 0x16f   : > { %569 = vpow2.f32 %v500_v13 }
 0x17c   : > { %v570_v14 = vpop.eup %569 }
 0x17d   : > { %v319_v15 = vadd.f32 1.0, %v570_v14 }
 0x17f   : > { %571 = vrcp.f32 %v319_v15 }
 0x18c   : > { %v572_v16 = vpop.eup %571 }
 0x18d   : > { %v322_v17 = vmul.f32 %v572_v16, %v313_v11 }
 0x18f   : > { %520 = vmatpush3.msra.mxu1 %v322_v17 }
 0x190   : > { %522 = vmatmul.mubr.msk.f32.vlgmr.msra.gmra.mxu1 %vm323_vm3, %v236_v18 }
 0x250   : > { %v393_v21 = vpop.f32.mrf.mxu1 }
 0x251   : > { %v394_v22 = vadd.f32 %v393_v21, %v238_v20 }
 0x252   : > { %v523_v23 = vpop.f32.mrf.mxu1 }
 0x253   : > { %v502_v24 = vmul.f32 -1.442695, %v394_v22 }
 0x255   : > { %573 = vpow2.f32 %v502_v24 }
 0x262   : > { %v574_v25 = vpop.eup %573 }
 0x263   : > { %v400_v26 = vadd.f32 1.0, %v574_v25 }
 0x265   : > { %575 = vrcp.f32 %v400_v26 }
 0x272   : > { %v576_v27 = vpop.eup %575 }
 0x273   : > { %405 = vperm.xlu0 %567, %v576_v27  }
 0x2ee   : > { %v406_v34 = vpop.permute.xlu0 %405 }
 0x2ef   : > { %v413_v35 = vrot.slane %v406_v34, %v412_v33 }
 0x2f1   : > { %v415_v36 = vmul.f32 %v413_v35, %v223_v0 }
 0x2f3   : > { %416 = vst [vmem:[%s217_s30] sm:$0xff] %v415_v36 }
 0x2f4   : > { %590 = shalt.err (!%p587_p3)
}
 0x2f5   : > { %s591_s14 = scalar_lea.hbm %s430_s9, 128  ;;  %s595_s17 = scalar_lea.hbm %s781_s5, 256 }
 0x2f6   : > { %p592_p4 = scmp.ne.s32.totalorder %s430_s9, %s591_s14  ;;  %p596_p9 = scmp.lt.s32.totalorder %s430_s9, %s781_s5 }
 0x2f7   : > { %p597_p10 = scmp.lt.s32.totalorder %s595_s17, %s591_s14 }
 0x2f8   : > { %p593_p7 = pnand %p592_p4, %p712_p5 }
 0x2f9   : > { %p598_p11 = por %p597_p10, %p596_p9 }
 0x2fa   : > { %p594_p8 = pneg %p593_p7 }
 0x2fc   : > { %p599_p12 = pnand %p598_p11, %p594_p8 }
 0x2fe   : > { %602 = shalt.err (!%p599_p12)
}
 0x2ff   : > { %524 = dma.vmem_to_hbm [thread:$0]  (%p712_p5), %s433_s6, 128, %s430_s9, %s418_s10  }
 0x300 PF: > { %p530_p13 = scmp.ge.s32.totalorder %s637_s21, 2  ;;  %s444_s26 = sand.u32 1, %s625_s18  }
 0x301   : > { %s445_s30 = scalar_lea.sflag [#allocation3], %s444_s26 }
 0x302   : > { %p527_p0 = pnand %p530_p13, %p716_p6 }
 0x304   : > { %p528_p1 = pneg %p527_p0 }
 0x306   : > { %620 = dma.done.wait (%p528_p1), %s445_s30, 128  }
 0x307   : > { %622 = vsyncadd (%p528_p1), %s445_s30, 4294967168  ;;  %p15_p2 = scmp.ge.s32.totalorder %s699_s24, 4   ;;  %s784_s18 = smov %s629_s19 }
 0x308   : > { %s785_s19 = smov %s633_s20  ;;  %s786_s20 = smov %s710_s27 }
 0x309   : > { %s787_s21 = smov %s699_s24  ;;  %17 = sbr.rel (!%p15_p2) target bundleno = 3 (0x3), region = 75 }
 0x30e   :  { %450 = vsyncpa [#allocation3], 1 }
 0x30f   :  { %452 = vsyncpa [#allocation3 + $0x1], 1 }

</bundles_post_ra>
